<compile_context>
chip_gen: v7x
topology: tpu7x:2x2x1
jax: 0.10.0
libtpu: 0.0.40
codegen_flags: <defaults>
</compile_context>

<pallas_src>
import functools
import math

import jax
import jax.numpy as jnp
from jax import lax
from jax.experimental import pallas as pl
from jax.experimental.pallas import tpu as pltpu


def _attn_kernel(q_ref, k_ref, v_ref, m_ref, o_ref, *, scale):
    """Single-invocation fused attention; whole (unpadded) arrays in VMEM."""
    q = q_ref[0]            # (Tq, D)   f32
    k = k_ref[0]            # (Tk, D)   f32
    v = v_ref[0]            # (Tk, Dv)  f32
    m = m_ref[...]          # (1, Tk)   int32, nonzero == masked out

    # Additive mask bias built in-kernel.  Large finite negative (-1e30) so
    # exp underflows to exactly 0 with no inf/nan hazards.
    bias = jnp.where(m != 0, jnp.float32(-1e30), jnp.float32(0.0))   # (1, Tk)

    # Scores: contract directly over D (lhs (Tq,D) x rhs (Tk,D)).
    # TODO(synk): if bundle dumps show Mosaic emitting a vxpose for this
    # contraction pattern, feed K pre-transposed as (D, Tk); negligible at
    # this problem size.
    qk = lax.dot_general(
        q, k,
        dimension_numbers=(((1,), (1,)), ((), ())),
        preferred_element_type=jnp.float32,
    )                                                                # (Tq, Tk)
    qk = qk * scale + bias                                           # bias broadcasts over rows

    # Numerically-stable softmax over keys; exact division (kernel is
    # launch-bound, approx reciprocal buys nothing and costs accuracy).
    m_row = jnp.max(qk, axis=-1, keepdims=True)
    p = jnp.exp(qk - m_row)
    denom = jnp.sum(p, axis=-1, keepdims=True)
    attn = p / denom

    out = lax.dot_general(
        attn, v,
        dimension_numbers=(((1,), (0,)), ((), ())),
        preferred_element_type=jnp.float32,
    )                                                                # (Tq, Dv)
    o_ref[0, 0, :, :] = out


@jax.jit
def attention_model(query, key, value, mask):
    """query: (1, Tq, D), key: (1, Tk, D), value: (1, Tk, Dv),
    mask: (1, Tk) bool/int (True / nonzero == masked out).

    Returns (1, 1, Tq, Dv), matching the PyTorch broadcast of the 4-D mask
    against the 3-D qk with B == 1.
    """
    B, Tq, D = query.shape
    _, Tk, Dv = value.shape
    assert B == 1 and key.shape[0] == 1 and value.shape[0] == 1
    # TODO(synk): general batched / multi-head case (B > 1) is not expressed
    # here (stack batch*heads on a "parallel" leading grid axis when needed,
    # to fill the MXU rows and use v7x's second TensorCore); the PyTorch test
    # module only exercises B = 1.

    # Only wrapper-side op: bool -> int32 mask cast (int32 mask keeps the
    # in-kernel select trivially lowerable).
    mask_i32 = mask.reshape(1, Tk).astype(jnp.int32)

    kernel = functools.partial(_attn_kernel, scale=1.0 / math.sqrt(float(D)))
    vmem = pltpu.MemorySpace.VMEM

    return pl.pallas_call(
        kernel,
        out_shape=jax.ShapeDtypeStruct((1, 1, Tq, Dv), jnp.float32),
        in_specs=[
            pl.BlockSpec(memory_space=vmem),   # query  (1, Tq, D)
            pl.BlockSpec(memory_space=vmem),   # key    (1, Tk, D)
            pl.BlockSpec(memory_space=vmem),   # value  (1, Tk, Dv)
            pl.BlockSpec(memory_space=vmem),   # mask   (1, Tk) int32
        ],
        out_specs=pl.BlockSpec(memory_space=vmem),
    )(query, key, value, mask_i32)


def _reference(query, key, value, mask):
    d_k = query.shape[-1]
    qk = jnp.einsum("bqd,bkd->bqk", query, key,
                    precision="highest") / math.sqrt(float(d_k))
    qk4 = qk[:, None, :, :]                        # (1, 1, Tq, Tk)
    m4 = mask[:, None, None, :]                    # (1, 1, 1, Tk)
    qk4 = jnp.where(m4, -jnp.inf, qk4)
    attn = jax.nn.softmax(qk4, axis=-1)
    return jnp.einsum("bhqk,bkd->bhqd", attn, value, precision="highest")


if __name__ == "__main__":
    rng = jax.random.PRNGKey(0)
    k1, k2, k3 = jax.random.split(rng, 3)

    Tq, Tk, D, Dv = 5, 7, 200, 12
    query = jax.random.normal(k1, (1, Tq, D), dtype=jnp.float32)
    key = jax.random.normal(k2, (1, Tk, D), dtype=jnp.float32)
    value = jax.random.normal(k3, (1, Tk, Dv), dtype=jnp.float32)
    # Boolean mask over keys (True == masked out); keep some keys unmasked so
    # the softmax is well-defined.
    mask = jnp.array([[False, False, False, True, False, True, False]],
                     dtype=jnp.bool_)

    out = attention_model(query, key, value, mask)
    jax.block_until_ready(out)

    ref = _reference(query, key, value, mask)
    assert out.shape == (1, 1, Tq, Dv), out.shape
    # Exact softmax division -> tight tolerance.
    assert jnp.allclose(out, ref, atol=1e-4, rtol=1e-4), "mismatch vs reference"

    print("KERNEL_OK")
</pallas_src>

<mosaic_0001>
module attributes {stable_mosaic.version = 11 : i64} {
  func.func @_attn_kernel(%arg0: memref<1x5x200xf32, #tpu.memory_space<vmem>>, %arg1: memref<1x7x200xf32, #tpu.memory_space<vmem>>, %arg2: memref<1x7x12xf32, #tpu.memory_space<vmem>>, %arg3: memref<1x7xi32, #tpu.memory_space<vmem>>, %arg4: memref<1x1x5x12xf32, #tpu.memory_space<vmem>>) attributes {dimension_semantics = [], scalar_prefetch = 0 : i64, scratch_operands = 0 : i64, tpu.core_type = #tpu.core_type<tc>} {
    %c0 = arith.constant 0 : index
    %c0_0 = arith.constant 0 : index
    %c0_1 = arith.constant 0 : index
    %0 = vector.load %arg0[%c0, %c0_0, %c0_1] : memref<1x5x200xf32, #tpu.memory_space<vmem>>, vector<1x5x200xf32>
    %1 = vector.shape_cast %0 : vector<1x5x200xf32> to vector<5x200xf32>
    %c0_2 = arith.constant 0 : index
    %c0_3 = arith.constant 0 : index
    %c0_4 = arith.constant 0 : index
    %2 = vector.load %arg1[%c0_2, %c0_3, %c0_4] : memref<1x7x200xf32, #tpu.memory_space<vmem>>, vector<1x7x200xf32>
    %3 = vector.shape_cast %2 : vector<1x7x200xf32> to vector<7x200xf32>
    %c0_5 = arith.constant 0 : index
    %c0_6 = arith.constant 0 : index
    %c0_7 = arith.constant 0 : index
    %4 = vector.load %arg2[%c0_5, %c0_6, %c0_7] : memref<1x7x12xf32, #tpu.memory_space<vmem>>, vector<1x7x12xf32>
    %5 = vector.shape_cast %4 : vector<1x7x12xf32> to vector<7x12xf32>
    %c0_8 = arith.constant 0 : index
    %c0_9 = arith.constant 0 : index
    %6 = vector.load %arg3[%c0_8, %c0_9] : memref<1x7xi32, #tpu.memory_space<vmem>>, vector<1x7xi32>
    %c0_i32 = arith.constant 0 : i32
    %7 = vector.broadcast %c0_i32 : i32 to vector<1x7xi32>
    %8 = arith.cmpi ne, %6, %7 : vector<1x7xi32>
    %cst = arith.constant -1.000000e+30 : f32
    %cst_10 = arith.constant 0.000000e+00 : f32
    %9 = vector.broadcast %cst : f32 to vector<1x7xf32>
    %10 = vector.broadcast %cst_10 : f32 to vector<1x7xf32>
    %11 = arith.select %8, %9, %10 : vector<1x7xi1>, vector<1x7xf32>
    %cst_11 = arith.constant dense<0.000000e+00> : vector<5x7xf32>
    %12 = tpu.matmul %1, %3, %cst_11 {dimension_numbers = #tpu.dot_dimension_numbers<[1], [1], [0], [0], [0, 0, 1, 0], [], []>} : vector<5x200xf32>, vector<7x200xf32>, vector<5x7xf32> -> vector<5x7xf32>
    %cst_12 = arith.constant 0.0707106814 : f32
    %13 = vector.broadcast %cst_12 : f32 to vector<5x7xf32>
    %14 = arith.mulf %12, %13 : vector<5x7xf32>
    %15 = vector.broadcast %11 : vector<1x7xf32> to vector<5x7xf32>
    %16 = arith.addf %14, %15 : vector<5x7xf32>
    %cst_13 = arith.constant dense<0xFF800000> : vector<5xf32>
    %17 = vector.multi_reduction <maximumf>, %16, %cst_13 [1] : vector<5x7xf32> to vector<5xf32>
    %18 = vector.shape_cast %17 : vector<5xf32> to vector<5x1xf32>
    %19 = vector.broadcast %18 : vector<5x1xf32> to vector<5x7xf32>
    %20 = arith.subf %16, %19 : vector<5x7xf32>
    %21 = math.exp %20 : vector<5x7xf32>
    %cst_14 = arith.constant dense<0.000000e+00> : vector<5xf32>
    %22 = vector.multi_reduction <add>, %21, %cst_14 [1] : vector<5x7xf32> to vector<5xf32>
    %23 = vector.shape_cast %22 : vector<5xf32> to vector<5x1xf32>
    %24 = vector.broadcast %23 : vector<5x1xf32> to vector<5x7xf32>
    %25 = arith.divf %21, %24 : vector<5x7xf32>
    %cst_15 = arith.constant dense<0.000000e+00> : vector<5x12xf32>
    %26 = tpu.matmul %25, %5, %cst_15 {dimension_numbers = #tpu.dot_dimension_numbers<[1], [0], [0], [1], [0, 0, 1, 1], [], []>} : vector<5x7xf32>, vector<7x12xf32>, vector<5x12xf32> -> vector<5x12xf32>
    %c0_16 = arith.constant 0 : index
    %c0_17 = arith.constant 0 : index
    %c0_18 = arith.constant 0 : index
    %c0_19 = arith.constant 0 : index
    %27 = vector.load %arg4[%c0_16, %c0_17, %c0_18, %c0_19] : memref<1x1x5x12xf32, #tpu.memory_space<vmem>>, vector<1x1x5x12xf32>
    %28 = vector.shape_cast %27 : vector<1x1x5x12xf32> to vector<5x12xf32>
    %29 = vector.shape_cast %26 : vector<5x12xf32> to vector<1x1x5x12xf32>
    tpu.vector_store %arg4[%c0_16, %c0_17, %c0_18, %c0_19], %29 {strides = array<i32>} : memref<1x1x5x12xf32, #tpu.memory_space<vmem>>, vector<1x1x5x12xf32>,
    return
  }
}

</mosaic_0001>

<bundles_post_ra>
// kernel: attention_model.1
= control target key start
LH: loop header
LB: loop body
LE: loop exit
PB: predicated region body
PF: predicated region fallthrough
CT: control target
= control target key end

     0   :  { %vm25_vm0 = vcmask 588800   ;;  %v223_v4 = vmov 0.0   ;;  %v104_v5 = vlaneseq  ;;  %vm110_vm2 = vcmask 53248   ;;  %s271_s1 = inlined_call_operand.vmem [shape: f32[1,7,200], index: 1, kind: input, shape index: {}]   ;;  %s272_s0 = inlined_call_operand.vmem [shape: f32[1,5,200], index: 0, kind: input, shape index: {}]   ;;  %s273_s3 = inlined_call_operand.vmem [shape: s32[1,7], index: 3, kind: input, shape index: {}]   ;;  %s274_s2 = inlined_call_operand.vmem [shape: f32[1,7,12], index: 2, kind: input, shape index: {}]   ;;  %s275_s4 = inlined_call_operand.vmem [shape: f32[1,1,5,12], index: 4, kind: output, shape index: {}]  }
   0x1   :  { %v20_v0 = vld [vmem:[%s271_s1 + $0x8] sm:$0x7f]  ;;  %v19_v1 = vld [vmem:[%s271_s1] sm:$0x7f]  ;;  %212 = vmatprep.subr.mxu1 %v223_v4  ;;  %vm126_vm3 = vcmask 1046528   ;;  %vm224_vm4 = vmmov 0  }
   0x2   :  { %v18_v2 = vld [vmem:[%s272_s0 + $0x8] sm:$0x1f]  ;;  %206 = vmatprep.subr.msk.mxu0 %vm25_vm0, %v20_v0  ;;  %v17_v3 = vld [vmem:[%s272_s0] sm:$0x1f]  ;;  %v105_v7 = vshrl.u32 %v104_v5, 7  ;;  %214 = vmatprep.mubr.msk.f32.mxu1 %vm224_vm4, %v223_v4  ;;  %vm122_vm5 = vcmask 56320  }
   0x3   :  { %207 = vmatprep.mubr.msk.f32.mxu0 %vm25_vm0, %v18_v2  ;;  %33 = vmatpush1.xpose.msra.mxu0 %v19_v1  ;;  %v22_v6 = vld [vmem:[%s273_s3] sm:$0x1]  ;;  %vm200_vm6 = vcmask 94208  }
   0x4   :  { %vm23_vm1 = vcmp.ne.s32.totalorder %v22_v6, 0  ;;  %v106_v8 = vsub.s32 0, %v105_v7  ;;  %v21_v21 = vld [vmem:[%s274_s2] sm:$0x7f] }
   0x5   :  { %v24_v9 = vsel %vm23_vm1, -1e+30, %v223_v4  ;;  %213 = vmatpush3.msk.msra.mxu1 %vm126_vm3, %v21_v21 }
   0x6   :  { %97 = vmatmul.mubr.f32.vlgmr.msra.gmra.mrb[0].mxu0 %v17_v3  ;;  %v107_v10 = vrot.slane %v24_v9, %v106_v8 }
  0xd9   :  { %v98_v11 = vpop.f32.mrb[0].mxu0 }
  0xda   :  { %v102_v12 = vmul.f32 0.07071068, %v98_v11  ;;  %v100_v13 = vpop.f32.mrb[1].mxu0 }
  0xdc   :  { %v109_v14 = vadd.f32 %v107_v10, %v102_v12 }
  0xde   :  { %v111_v15 = vsel %vm110_vm2, %v109_v14, -inf }
  0xdf   :  { %112 = vmax.xlane.f32.xlu0 %v111_v15 }
 0x16c   :  { %v113_v16 = vpop.xlane.xlu0 %112 }
 0x16d   :  { %v114_v17 = vsub.f32 %v109_v14, %v113_v16 }
 0x16f   :  { %v115_v18 = vmul.f32 1.442695, %v114_v17 }
 0x171   :  { %219 = vpow2.f32 %v115_v18 }
 0x17b   :  { %v220_v19 = vpop.eup %219 }
 0x17c   :  { %v117_v20 = vsel %vm110_vm2, %v220_v19, 0.0 }
 0x17d   :  { %118 = vadd.xlane.f32.xlu0 %v117_v20 }
 0x20a   :  { %v119_v22 = vpop.xlane.xlu0 %118 }
 0x20b   :  { %221 = vrcp.f32 %v119_v22 }
 0x215   :  { %v222_v23 = vpop.eup %221 }
 0x216   :  { %v121_v24 = vmul.f32 %v222_v23, %v220_v19 }
 0x218   :  { %215 = vmatmul.mubr.msk.f32.vlgmr.msra.gmra.mrb[0].mxu1 %vm122_vm5, %v121_v24 }
 0x2eb   :  { %v196_v25 = vpop.f32.mrb[0].mxu1 }
 0x2ec   :  { %201 = vst.msk [vmem:[%s275_s4] sm:$0x1f] %vm200_vm6, %v196_v25  ;;  %v216_v26 = vpop.f32.mrb[1].mxu1 }

</bundles_post_ra>
